<compile_context>
chip_gen: v5e
topology: v5e:2x2
jax: 0.10.0
libtpu: 0.0.40
codegen_flags: <defaults>
</compile_context>

<pallas_src>
import functools

import jax
import jax.numpy as jnp
from jax.experimental import pallas as pl
from jax.experimental.pallas import tpu as pltpu

_PACK = 8  # samples packed per row (8 * in_dim lanes; 8 * 16 = 128 for ADULT)


def _adult_encoder_kernel(x_ref, w1_ref, b1_ref, w2_ref, b2_ref, out_ref):
    # x_ref: (rows, P*D) packed batch tile.  All operands / results lane-dense.
    h = jnp.dot(x_ref[...], w1_ref[...], preferred_element_type=jnp.float32)
    h = jnp.maximum(h + b1_ref[...], 0.0)                                # fc1 + ReLU
    z = jnp.dot(h, w2_ref[...], preferred_element_type=jnp.float32)
    out_ref[...] = jnp.tanh(z + b2_ref[...]).astype(out_ref.dtype)       # fc2 + tanh


def adult_encoder(x, w1, b1, w2, b2, *, block_batch=32768):
    """out = tanh(relu(x @ w1 + b1) @ w2 + b2), x: (B, D), w1: (D, H), w2: (H, L)."""
    B, D = x.shape
    H = w1.shape[1]
    L = w2.shape[1]
    P = _PACK

    # ---- pack P consecutive samples per row (free reshape when B % P == 0) ----
    Bp = ((B + P - 1) // P) * P
    if Bp != B:
        x = jnp.pad(x, ((0, Bp - B), (0, 0)))   # rare path; one extra copy of x
    R = Bp // P                                  # packed rows
    x2 = x.reshape(R, P * D)

    # Block-diagonal weights / tiled biases: lets the packed layout feed the MXU
    # directly, with zero in-kernel transposes/relayouts.
    w1_bd = jnp.kron(jnp.eye(P, dtype=w1.dtype), w1)          # (P*D, P*H)
    w2_bd = jnp.kron(jnp.eye(P, dtype=w2.dtype), w2)          # (P*H, P*L)
    b1_bd = jnp.tile(b1, P).reshape(1, P * H)
    b2_bd = jnp.tile(b2, P).reshape(1, P * L)

    # ---- batch tiling (packed rows per grid step) ----
    rows_per_block = max(block_batch // P, 8)          # clamp: never 0 / sub-sublane
    rows_per_block = min(rows_per_block, R)
    if rows_per_block < R:
        rows_per_block = max(8, (rows_per_block // 8) * 8)    # sublane-aligned
    # Keep >= 2 grid steps when possible so v7x can shard the batch over 2 TCs.
    if pl.cdiv(R, rows_per_block) < 2 and R > 8:
        rows_per_block = min(rows_per_block, ((pl.cdiv(R, 2) + 7) // 8) * 8)
    grid = (pl.cdiv(R, rows_per_block),)               # ragged tail masked by Pallas

    cost = pl.CostEstimate(
        flops=2 * R * (P * D * P * H + P * H * P * L),
        transcendentals=Bp * L,
        bytes_accessed=4 * (Bp * D + Bp * L + P * P * (D * H + H * L) + P * (H + L)),
    )

    out2 = pl.pallas_call(
        _adult_encoder_kernel,
        out_shape=jax.ShapeDtypeStruct((R, P * L), x.dtype),
        grid=grid,
        in_specs=[
            pl.BlockSpec((rows_per_block, P * D), lambda i: (i, 0)),  # streamed x tile
            pl.BlockSpec((P * D, P * H), lambda i: (0, 0)),           # resident W1 (block-diag)
            pl.BlockSpec((1, P * H), lambda i: (0, 0)),               # resident b1
            pl.BlockSpec((P * H, P * L), lambda i: (0, 0)),           # resident W2 (block-diag)
            pl.BlockSpec((1, P * L), lambda i: (0, 0)),               # resident b2
        ],
        out_specs=pl.BlockSpec((rows_per_block, P * L), lambda i: (i, 0)),
        compiler_params=pltpu.CompilerParams(
            dimension_semantics=("parallel",),
            vmem_limit_bytes=32 * 1024 * 1024,
        ),
        cost_estimate=cost,
    )(x2, w1_bd, b1_bd, w2_bd, b2_bd)

    out = out2.reshape(Bp, L)                           # free reshape back to (B, L)
    return out[:B] if Bp != B else out


def _reference(x, w1, b1, w2, b2):
    h = jax.nn.relu(x @ w1 + b1)
    return jnp.tanh(h @ w2 + b2)


if __name__ == "__main__":
    # Small ADULT-like tabular shapes.  batch=400 exercises the packed layout
    # (50 packed rows) and, with block_batch=128 (16 packed rows per block),
    # a cdiv grid of 4 steps with a masked ragged last block.
    batch, in_dim, hidden_dim, latent_dim = 400, 16, 32, 8

    key = jax.random.PRNGKey(0)
    kx, kw1, kb1, kw2, kb2 = jax.random.split(key, 5)

    x = jax.random.normal(kx, (batch, in_dim), dtype=jnp.float32)
    # Deterministic "LazyLinear-materialized" parameters.
    w1 = jax.random.normal(kw1, (in_dim, hidden_dim), dtype=jnp.float32) * 0.1
    b1 = jax.random.normal(kb1, (hidden_dim,), dtype=jnp.float32) * 0.1
    w2 = jax.random.normal(kw2, (hidden_dim, latent_dim), dtype=jnp.float32) * 0.1
    b2 = jax.random.normal(kb2, (latent_dim,), dtype=jnp.float32) * 0.1

    run = jax.jit(functools.partial(adult_encoder, block_batch=128))
    out = jax.block_until_ready(run(x, w1, b1, w2, b2))

    ref = _reference(x, w1, b1, w2, b2)
    assert out.shape == (batch, latent_dim)
    assert jnp.allclose(out, ref, atol=1e-5, rtol=1e-5), "mismatch vs JAX reference"

    print("KERNEL_OK")
</pallas_src>

<mosaic_0001>
module attributes {stable_mosaic.version = 11 : i64} {
  func.func @_adult_encoder_kernel(%arg0: i32, %arg1: memref<16x128xf32, #tpu.memory_space<vmem>>, %arg2: memref<128x256xf32, #tpu.memory_space<vmem>>, %arg3: memref<1x256xf32, #tpu.memory_space<vmem>>, %arg4: memref<256x64xf32, #tpu.memory_space<vmem>>, %arg5: memref<1x64xf32, #tpu.memory_space<vmem>>, %arg6: memref<16x64xf32, #tpu.memory_space<vmem>>) attributes {dimension_semantics = [#tpu.dimension_semantics<parallel>], iteration_bounds = array<i64: 4>, scalar_prefetch = 0 : i64, scratch_operands = 0 : i64, tpu.core_type = #tpu.core_type<tc>, window_params = [{transform_indices = @transform_0, window_bounds = array<i64: 16, 128>}, {pipeline_mode = #tpu.pipeline_mode<synchronous>, transform_indices = @transform_1, window_bounds = array<i64: 128, 256>}, {pipeline_mode = #tpu.pipeline_mode<synchronous>, transform_indices = @transform_2, window_bounds = array<i64: 1, 256>}, {pipeline_mode = #tpu.pipeline_mode<synchronous>, transform_indices = @transform_3, window_bounds = array<i64: 256, 64>}, {pipeline_mode = #tpu.pipeline_mode<synchronous>, transform_indices = @transform_4, window_bounds = array<i64: 1, 64>}, {transform_indices = @transform_5, window_bounds = array<i64: 16, 64>}]} {
    %c0 = arith.constant 0 : index
    %c0_0 = arith.constant 0 : index
    %0 = vector.load %arg1[%c0, %c0_0] : memref<16x128xf32, #tpu.memory_space<vmem>>, vector<16x128xf32>
    %c0_1 = arith.constant 0 : index
    %c0_2 = arith.constant 0 : index
    %1 = vector.load %arg2[%c0_1, %c0_2] : memref<128x256xf32, #tpu.memory_space<vmem>>, vector<128x256xf32>
    %cst = arith.constant dense<0.000000e+00> : vector<16x256xf32>
    %2 = tpu.matmul %0, %1, %cst {dimension_numbers = #tpu.dot_dimension_numbers<[1], [0], [0], [1], [0, 0, 1, 1], [], []>} : vector<16x128xf32>, vector<128x256xf32>, vector<16x256xf32> -> vector<16x256xf32>
    %c0_3 = arith.constant 0 : index
    %c0_4 = arith.constant 0 : index
    %3 = vector.load %arg3[%c0_3, %c0_4] : memref<1x256xf32, #tpu.memory_space<vmem>>, vector<1x256xf32>
    %4 = vector.broadcast %3 : vector<1x256xf32> to vector<16x256xf32>
    %5 = arith.addf %2, %4 : vector<16x256xf32>
    %cst_5 = arith.constant 0.000000e+00 : f32
    %6 = vector.broadcast %cst_5 : f32 to vector<16x256xf32>
    %7 = arith.maximumf %5, %6 : vector<16x256xf32>
    %c0_6 = arith.constant 0 : index
    %c0_7 = arith.constant 0 : index
    %8 = vector.load %arg4[%c0_6, %c0_7] : memref<256x64xf32, #tpu.memory_space<vmem>>, vector<256x64xf32>
    %cst_8 = arith.constant dense<0.000000e+00> : vector<16x64xf32>
    %9 = tpu.matmul %7, %8, %cst_8 {dimension_numbers = #tpu.dot_dimension_numbers<[1], [0], [0], [1], [0, 0, 1, 1], [], []>} : vector<16x256xf32>, vector<256x64xf32>, vector<16x64xf32> -> vector<16x64xf32>
    %c0_9 = arith.constant 0 : index
    %c0_10 = arith.constant 0 : index
    %10 = vector.load %arg5[%c0_9, %c0_10] : memref<1x64xf32, #tpu.memory_space<vmem>>, vector<1x64xf32>
    %11 = vector.broadcast %10 : vector<1x64xf32> to vector<16x64xf32>
    %12 = arith.addf %9, %11 : vector<16x64xf32>
    %13 = math.tanh %12 : vector<16x64xf32>
    %c0_11 = arith.constant 0 : index
    %c0_12 = arith.constant 0 : index
    %14 = vector.load %arg6[%c0_11, %c0_12] : memref<16x64xf32, #tpu.memory_space<vmem>>, vector<16x64xf32>
    tpu.vector_store %arg6[%c0_11, %c0_12], %13 {strides = array<i32>} : memref<16x64xf32, #tpu.memory_space<vmem>>, vector<16x64xf32>,
    return
  }
  func.func @transform_0(%arg0: i32) -> (i32, i32) {
    %c0_i32 = arith.constant 0 : i32
    %c0_i32_0 = arith.constant 0 : i32
    return %arg0, %c0_i32 : i32, i32
  }
  func.func @transform_1(%arg0: i32) -> (i32, i32) {
    %c0_i32 = arith.constant 0 : i32
    %c0_i32_0 = arith.constant 0 : i32
    %c0_i32_1 = arith.constant 0 : i32
    return %c0_i32, %c0_i32_0 : i32, i32
  }
  func.func @transform_2(%arg0: i32) -> (i32, i32) {
    %c0_i32 = arith.constant 0 : i32
    %c0_i32_0 = arith.constant 0 : i32
    %c0_i32_1 = arith.constant 0 : i32
    return %c0_i32, %c0_i32_0 : i32, i32
  }
  func.func @transform_3(%arg0: i32) -> (i32, i32) {
    %c0_i32 = arith.constant 0 : i32
    %c0_i32_0 = arith.constant 0 : i32
    %c0_i32_1 = arith.constant 0 : i32
    return %c0_i32, %c0_i32_0 : i32, i32
  }
  func.func @transform_4(%arg0: i32) -> (i32, i32) {
    %c0_i32 = arith.constant 0 : i32
    %c0_i32_0 = arith.constant 0 : i32
    %c0_i32_1 = arith.constant 0 : i32
    return %c0_i32, %c0_i32_0 : i32, i32
  }
  func.func @transform_5(%arg0: i32) -> (i32, i32) {
    %c0_i32 = arith.constant 0 : i32
    %c0_i32_0 = arith.constant 0 : i32
    return %arg0, %c0_i32 : i32, i32
  }
}

</mosaic_0001>

<bundles_post_ra>
// kernel: tile.13
= control target key start
LH: loop header
LB: loop body
LE: loop exit
PB: predicated region body
PF: predicated region fallthrough
CT: control target
= control target key end

     0   :  { %s22_s0 = inlined_call_operand.vmem [shape: f32[32], index: 0, kind: input, shape index: {}]   ;;  %s23_s1 = inlined_call_operand.vmem [shape: f32[8,32], index: 1, kind: output, shape index: {}]  }
   0x1   :  { %v4_v0 = vld [vmem:[%s22_s0] ss:$0 sm:$0xff] }
   0x2   :  { %5 = vst [vmem:[%s23_s1] sm:$0xff] %v4_v0 }

// kernel: tile.14
= control target key start
LH: loop header
LB: loop body
LE: loop exit
PB: predicated region body
PF: predicated region fallthrough
CT: control target
= control target key end

     0   :  { %s7_s6 = smov 3  ;;  %s46_s9 = smov 96   ;;  %vm4_vm0 = vcmask 261120   ;;  %vm11_vm1 = vcmask 1048320   ;;  %vm18_vm2 = vcmask 785920   ;;  %vm25_vm3 = vcmask 523520   ;;  %s77_s0 = inlined_call_operand.vmem [shape: f32[8,32], index: 0, kind: input, shape index: {}]   ;;  %s78_s1 = inlined_call_operand.vmem [shape: f32[1,256], index: 1, kind: output, shape index: {}]  }
   0x1   :  { %v39_v0 = vld [vmem:[%s77_s0 + $0x3] ss:$4 sm:%s7_s6]   ;;  %s21_s10 = smov 3  ;;  %s14_s13 = smov 3 }
   0x2   :  { %9 = vrot.lane.b32.xlu0 %v39_v0, %s46_s9  ;;  %v41_v1 = vld [vmem:[%s77_s0 + $0x1] ss:$4 sm:%s21_s10]   ;;  %s47_s14 = smov 32   ;;  %s48_s17 = smov 64  }
   0x3   :  { %23 = vrot.lane.b32.xlu1 %v41_v1, %s47_s14  ;;  %v40_v2 = vld [vmem:[%s77_s0 + $0x2] ss:$4 sm:%s14_s13]   ;;  %s2_s18 = smov 3 }
   0x4   :  { %v3_v3 = vld [vmem:[%s77_s0] ss:$4 sm:%s2_s18]  }
   0x5   :  { %5 = vst.msk [vmem:[#allocation0] ss:$8 sm:$0x3] %vm4_vm0, %v3_v3  }
   0xa   :  { %16 = vrot.lane.b32.xlu0 %v40_v2, %s48_s17 }
  0x74   :  { %v10_v4 = vpop.permute.xlu0 %9  }
  0x75   :  { %12 = vst.msk [vmem:[#allocation0] ss:$8 sm:$0x3] %vm11_vm1, %v10_v4   ;;  %v24_v5 = vpop.permute.xlu1 %23  }
  0x7c   :  { %v17_v6 = vpop.permute.xlu0 %16  }
  0x7d   :  { %19 = vst.msk [vmem:[#allocation0] ss:$8 sm:$0x3] %vm18_vm2, %v17_v6  }
  0x7e   :  { %26 = vst.msk [vmem:[#allocation0] ss:$8 sm:$0x3] %vm25_vm3, %v24_v5  }
  0x85   :  { %v29_v7 = vld [vmem:[#allocation0] sm:$0x1]  ;;  %v34_v8 = vld [vmem:[#allocation0 + $0x8] sm:$0x1] }
  0x86   :  { %32 = vst [vmem:[%s78_s1] sm:$0x1] %v29_v7 }
  0x87   :  { %42 = vst [vmem:[%s78_s1 + $0x1] sm:$0x1] %v34_v8 }

// kernel: tile.18
= control target key start
LH: loop header
LB: loop body
LE: loop exit
PB: predicated region body
PF: predicated region fallthrough
CT: control target
= control target key end

     0   :  { %s22_s0 = inlined_call_operand.vmem [shape: f32[8], index: 0, kind: input, shape index: {}]   ;;  %s23_s1 = inlined_call_operand.vmem [shape: f32[8,8], index: 1, kind: output, shape index: {}]  }
   0x1   :  { %v4_v0 = vld [vmem:[%s22_s0] ss:$0 sm:$0xff] }
   0x2   :  { %5 = vst [vmem:[%s23_s1] sm:$0xff] %v4_v0 }

// kernel: tile.19
= control target key start
LH: loop header
LB: loop body
LE: loop exit
PB: predicated region body
PF: predicated region fallthrough
CT: control target
= control target key end

     0   :  { %s67_s10 = smov 56   ;;  %s68_s11 = smov 40   ;;  %vm3_vm0 = vcmask 64512   ;;  %vm9_vm1 = vcmask 523712   ;;  %vm15_vm2 = vcmask 458112   ;;  %vm21_vm3 = vcmask 392512   ;;  %s111_s0 = inlined_call_operand.vmem [shape: f32[8,8], index: 0, kind: input, shape index: {}]   ;;  %s112_s1 = inlined_call_operand.vmem [shape: f32[1,64], index: 1, kind: output, shape index: {}]  }
   0x1   :  { %v53_v0 = vld [vmem:[%s111_s0 + $0x7] sm:$0x1]   ;;  %v55_v1 = vld [vmem:[%s111_s0 + $0x5] sm:$0x1]   ;;  %v57_v2 = vld [vmem:[%s111_s0 + $0x3] sm:$0x1]  }
   0x2   :  { %7 = vrot.lane.b32.xlu0 %v53_v0, %s67_s10  ;;  %19 = vrot.lane.b32.xlu1 %v55_v1, %s68_s11  ;;  %s69_s14 = smov 24   ;;  %v54_v3 = vld [vmem:[%s111_s0 + $0x6] sm:$0x1]   ;;  %v56_v4 = vld [vmem:[%s111_s0 + $0x4] sm:$0x1]   ;;  %s70_s21 = smov 48  }
   0x3   :  { %31 = vrot.lane.b32.xlu2 %v57_v2, %s69_s14  ;;  %v58_v5 = vld [vmem:[%s111_s0 + $0x2] sm:$0x1]   ;;  %s71_s22 = smov 32   ;;  %s72_s23 = smov 16   ;;  %v59_v6 = vld [vmem:[%s111_s0 + $0x1] sm:$0x1]  }
   0x4   :  { %s73_s26 = smov 8   ;;  %v2_v7 = vld [vmem:[%s111_s0] sm:$0x1]   ;;  %vm27_vm4 = vcmask 326912   ;;  %vm33_vm5 = vcmask 261312   ;;  %vm39_vm6 = vcmask 195712  }
   0x5   :  { %4 = vst.msk [vmem:[#allocation0] sm:$0x1] %vm3_vm0, %v2_v7   ;;  %vm45_vm7 = vcmask 130112  }
   0xa   :  { %13 = vrot.lane.b32.xlu0 %v54_v3, %s70_s21  ;;  %25 = vrot.lane.b32.xlu1 %v56_v4, %s71_s22 }
   0xb   :  { %37 = vrot.lane.b32.xlu2 %v58_v5, %s72_s23 }
  0x12   :  { %43 = vrot.lane.b32.xlu0 %v59_v6, %s73_s26 }
  0x5d   :  { %v32_v8 = vpop.permute.xlu2 %31  }
  0x65   :  { %v38_v9 = vpop.permute.xlu2 %37  }
  0x74   :  { %v8_v10 = vpop.permute.xlu0 %7   ;;  %v20_v11 = vpop.permute.xlu1 %19  }
  0x75   :  { %10 = vst.msk [vmem:[#allocation0] sm:$0x1] %vm9_vm1, %v8_v10  }
  0x7c   :  { %v14_v12 = vpop.permute.xlu0 %13   ;;  %v26_v13 = vpop.permute.xlu1 %25  }
  0x7d   :  { %16 = vst.msk [vmem:[#allocation0] sm:$0x1] %vm15_vm2, %v14_v12  }
  0x7e   :  { %22 = vst.msk [vmem:[#allocation0] sm:$0x1] %vm21_vm3, %v20_v11  }
  0x7f   :  { %28 = vst.msk [vmem:[#allocation0] sm:$0x1] %vm27_vm4, %v26_v13  }
  0x80   :  { %34 = vst.msk [vmem:[#allocation0] sm:$0x1] %vm33_vm5, %v32_v8  }
  0x81   :  { %40 = vst.msk [vmem:[#allocation0] sm:$0x1] %vm39_vm6, %v38_v9  }
  0x84   :  { %v44_v14 = vpop.permute.xlu0 %43  }
  0x85   :  { %46 = vst.msk [vmem:[#allocation0] sm:$0x1] %vm45_vm7, %v44_v14  }
  0x8c   :  { %v49_v15 = vld [vmem:[#allocation0] sm:$0x1] }
  0x8d   :  { %52 = vst [vmem:[%s112_s1] sm:$0x1] %v49_v15 }

// kernel: adult_encoder.1
= control target key start
LH: loop header
LB: loop body
LE: loop exit
PB: predicated region body
PF: predicated region fallthrough
CT: control target
= control target key end

     0   :  { %s881_s18 = smov 0   ;;  %s883_s19 = smov 0   ;;  %s1167_s0 = inlined_call_operand.vmem [shape: f32[50,128], index: 0, kind: input, shape index: {}]   ;;  %s1168_s1 = inlined_call_operand.vmem [shape: f32[128,256], index: 1, kind: input, shape index: {}]   ;;  %s1169_s2 = inlined_call_operand.vmem [shape: f32[1,256], index: 2, kind: input, shape index: {}]   ;;  %s1170_s3 = inlined_call_operand.vmem [shape: f32[256,64], index: 3, kind: input, shape index: {}]   ;;  %s1171_s4 = inlined_call_operand.vmem [shape: f32[1,64], index: 4, kind: input, shape index: {}]   ;;  %s1172_s5 = inlined_call_operand.vmem [shape: f32[50,64], index: 5, kind: output, shape index: {}]  }
   0x1   :  { %s885_s20 = smov 0  }
   0x2 LB: > { %s894_s21 = sadd.s32 4294967295, %s817_s20   ;;  %s896_s22 = sadd.s32 1, %s817_s20   ;;  %s817_s20 = sphi %s885_s20, %s1176_s20   ;;  %s813_s19 = sphi %s883_s19, %s1175_s19   ;;  %s809_s18 = sphi %s881_s18, %s1174_s18  }
   0x3   : > { %s129_s23 = ssub.s32 %s817_s20, %s896_s22  ;;  %s132_s24 = sadd.s32 1, %s813_s19 }
   0x4   : > { %p130_p0 = scmp.eq.s32.totalorder %s129_s23, 0  ;;  %p142_p1 = scmp.ne.s32.totalorder %s813_s19, %s809_s18 }
   0x5   : > { %p143_p2 = scmp.eq.s32.totalorder %s894_s21, 3  ;;  %p646_p3 = scmp.ge.s32.totalorder %s817_s20, 1 }
   0x6   : > { %s904_s25 = scalar_select %p130_p0, %s813_s19, %s132_s24  }
   0x7   : > { %p906_p4 = por %p143_p2, %p142_p1  ;;  %p196_p5 = scmp.lt.s32.totalorder %s817_s20, 5 }
   0x9   : > { %p197_p6 = pnand %p646_p3, %p196_p5 }
   0xa   : > { %s965_s23 = sshll.u32 (!%p197_p6), %s894_s21, 1  ;;  %s224_s15 = sand.u32 (!%p197_p6), 1, %s809_s18  }
   0xb   : > { %200 = sbr.rel (%p197_p6) target bundleno = 369 (0x171), region = 40  ;;  %p232_p7 = scmp.lt.s32.totalorder (!%p197_p6), %s965_s23, 6 }
   0xc   : > { %s647_s16 = sshll.u32 (!%p197_p6), %s224_s15, 4 }
   0xd   : > { %s1122_s17 = scalar_lea.vmem (!%p197_p6), [#allocation2], %s647_s16  }
  0x10   : > { %v278_v0 = vld [vmem:[%s1168_s1 + $0xf0] sm:$0xff]  ;;  %v276_v1 = vld [vmem:[%s1168_s1 + $0xe0] sm:$0xff]  ;;  %v279_v2 = vld [vmem:[%s1168_s1 + $0xf8] sm:$0xff]  ;;  %s1010_s9 = scalar_select %p232_p7, %s965_s23, 6  ;;  %vm420_vm0 = vcmask 523264  }
  0x11   : > { %286 = vmatpush.msra.mxu0 %v278_v0  ;;  %309 = vmatpush.msra.mxu1 %v279_v2  ;;  %v277_v3 = vld [vmem:[%s1168_s1 + $0xe8] sm:$0xff]  ;;  %v274_v4 = vld [vmem:[%s1168_s1 + $0xd0] sm:$0xff]  ;;  %v275_v5 = vld [vmem:[%s1168_s1 + $0xd8] sm:$0xff]  ;;  %s431_s18 = ssub.s32 (%p906_p4), 7, %s965_s23 }
  0x12   : > { %v272_v6 = vld [vmem:[%s1168_s1 + $0xc0] sm:$0xff]  ;;  %v273_v7 = vld [vmem:[%s1168_s1 + $0xc8] sm:$0xff]  ;;  %v270_v8 = vld [vmem:[%s1168_s1 + $0xb0] sm:$0xff]  ;;  %s649_s8 = sshll.u32 %s1010_s9, 3  ;;  %s667_s9 = sshll.u32 (%p906_p4), %s894_s21, 4 }
  0x13   : > { %287 = vmatpush.msra.mxu0 %v276_v1  ;;  %310 = vmatpush.msra.mxu1 %v277_v3  ;;  %v271_v9 = vld [vmem:[%s1168_s1 + $0xb8] sm:$0xff]  ;;  %v268_v10 = vld [vmem:[%s1168_s1 + $0xa0] sm:$0xff]  ;;  %v269_v11 = vld [vmem:[%s1168_s1 + $0xa8] sm:$0xff]  ;;  %s235_s11 = scalar_lea.vmem %s1167_s0, %s649_s8  ;;  %p432_p8 = scmp.lt.s32.totalorder (%p906_p4), %s431_s18, 2 }
  0x14   : > { %v266_v12 = vld [vmem:[%s1168_s1 + $0x90] sm:$0xff]  ;;  %v267_v13 = vld [vmem:[%s1168_s1 + $0x98] sm:$0xff]  ;;  %v264_v16 = vld [vmem:[%s1168_s1 + $0x80] sm:$0xff]  ;;  %s1133_s24 = scalar_lea.vmem (%p906_p4), %s1172_s5, %s667_s9  }
  0x15   : > { %288 = vmatpush.msra.mxu0 %v274_v4  ;;  %311 = vmatpush.msra.mxu1 %v275_v5  ;;  %v351_v14 = vld [vmem:[%s1170_s3 + $0x78] sm:$0xff]  ;;  %v350_v15 = vld [vmem:[%s1170_s3 + $0x70] sm:$0xff]  ;;  %v265_v17 = vld [vmem:[%s1168_s1 + $0x88] sm:$0xff] }
  0x16   : > { %372 = vmatpush.msra.mxu2 %v351_v14  ;;  %v367_v18 = vld [vmem:[%s1170_s3 + $0xf8] sm:$0xff]  ;;  %v349_v19 = vld [vmem:[%s1170_s3 + $0x68] sm:$0xff]  ;;  %v366_v20 = vld [vmem:[%s1170_s3 + $0xf0] sm:$0xff] }
  0x17   : > { %289 = vmatpush.msra.mxu0 %v272_v6  ;;  %312 = vmatpush.msra.mxu1 %v273_v7  ;;  %v262_v21 = vld [vmem:[%s1168_s1 + $0x70] sm:$0xff]  ;;  %v263_v22 = vld [vmem:[%s1168_s1 + $0x78] sm:$0xff]  ;;  %v348_v23 = vld [vmem:[%s1170_s3 + $0x60] sm:$0xff] }
  0x18   : > { %373 = vmatpush.msra.mxu2 %v350_v15  ;;  %395 = vmatpush.msra.mxu3 %v367_v18  ;;  %v365_v24 = vld [vmem:[%s1170_s3 + $0xe8] sm:$0xff]  ;;  %v260_v25 = vld [vmem:[%s1168_s1 + $0x60] sm:$0xff]  ;;  %v347_v27 = vld [vmem:[%s1170_s3 + $0x58] sm:$0xff] }
  0x19   : > { %290 = vmatpush.msra.mxu0 %v270_v8  ;;  %313 = vmatpush.msra.mxu1 %v271_v9  ;;  %v261_v26 = vld [vmem:[%s1168_s1 + $0x68] sm:$0xff]  ;;  %v364_v28 = vld [vmem:[%s1170_s3 + $0xe0] sm:$0xff]  ;;  %v258_v29 = vld [vmem:[%s1168_s1 + $0x50] sm:$0xff] }
  0x1a   : > { %374 = vmatpush.msra.mxu2 %v349_v19  ;;  %396 = vmatpush.msra.mxu3 %v366_v20  ;;  %v259_v30 = vld [vmem:[%s1168_s1 + $0x58] sm:$0xff]  ;;  %v346_v31 = vld [vmem:[%s1170_s3 + $0x50] sm:$0xff]  ;;  %v256_v33 = vld [vmem:[%s1168_s1 + $0x40] sm:$0xff] }
  0x1b   : > { %291 = vmatpush.msra.mxu0 %v268_v10  ;;  %314 = vmatpush.msra.mxu1 %v269_v11  ;;  %v363_v32 = vld [vmem:[%s1170_s3 + $0xd8] sm:$0xff]  ;;  %v257_v34 = vld [vmem:[%s1168_s1 + $0x48] sm:$0xff]  ;;  %v362_v36 = vld [vmem:[%s1170_s3 + $0xd0] sm:$0xff] }
  0x1c   : > { %375 = vmatpush.msra.mxu2 %v348_v23  ;;  %397 = vmatpush.msra.mxu3 %v365_v24  ;;  %v345_v35 = vld [vmem:[%s1170_s3 + $0x48] sm:$0xff]  ;;  %v254_v37 = vld [vmem:[%s1168_s1 + $0x30] sm:$0xff]  ;;  %v255_v38 = vld [vmem:[%s1168_s1 + $0x38] sm:$0xff] }
  0x1d   : > { %292 = vmatpush.msra.mxu0 %v266_v12  ;;  %315 = vmatpush.msra.mxu1 %v267_v13  ;;  %v344_v39 = vld [vmem:[%s1170_s3 + $0x40] sm:$0xff]  ;;  %v361_v40 = vld [vmem:[%s1170_s3 + $0xc8] sm:$0xff]  ;;  %v343_v43 = vld [vmem:[%s1170_s3 + $0x38] sm:$0xff] }
  0x1e   : > { %376 = vmatpush.msra.mxu2 %v347_v27  ;;  %398 = vmatpush.msra.mxu3 %v364_v28  ;;  %v252_v41 = vld [vmem:[%s1168_s1 + $0x20] sm:$0xff]  ;;  %v253_v42 = vld [vmem:[%s1168_s1 + $0x28] sm:$0xff]  ;;  %v250_v45 = vld [vmem:[%s1168_s1 + $0x10] sm:$0xff] }
  0x1f   : > { %293 = vmatpush.msra.mxu0 %v264_v16  ;;  %316 = vmatpush.msra.mxu1 %v265_v17  ;;  %v360_v44 = vld [vmem:[%s1170_s3 + $0xc0] sm:$0xff]  ;;  %v251_v46 = vld [vmem:[%s1168_s1 + $0x18] sm:$0xff]  ;;  %v342_v47 = vld [vmem:[%s1170_s3 + $0x30] sm:$0xff] }
  0x20   : > { %377 = vmatpush.msra.mxu2 %v346_v31  ;;  %399 = vmatpush.msra.mxu3 %v363_v32  ;;  %v359_v48 = vld [vmem:[%s1170_s3 + $0xb8] sm:$0xff]  ;;  %v248_v49 = vld [vmem:[%s1168_s1] sm:$0xff]  ;;  %v249_v50 = vld [vmem:[%s1168_s1 + $0x8] sm:$0xff] }
  0x21   : > { %294 = vmatpush.msra.mxu0 %v262_v21  ;;  %317 = vmatpush.msra.mxu1 %v263_v22  ;;  %v246_v51 = vld [vmem:[%s235_s11] sm:$0xff]  ;;  %v341_v52 = vld [vmem:[%s1170_s3 + $0x28] sm:$0xff]  ;;  %v358_v53 = vld [vmem:[%s1170_s3 + $0xb0] sm:$0xff] }
  0x22   : > { %378 = vmatpush.msra.mxu2 %v345_v35  ;;  %400 = vmatpush.msra.mxu3 %v362_v36  ;;  %v340_v54 = vld [vmem:[%s1170_s3 + $0x20] sm:$0xff]  ;;  %v357_v55 = vld [vmem:[%s1170_s3 + $0xa8] sm:$0xff]  ;;  %v339_v56 = vld [vmem:[%s1170_s3 + $0x18] sm:$0xff] }
  0x23   : > { %295 = vmatpush.msra.mxu0 %v260_v25  ;;  %318 = vmatpush.msra.mxu1 %v261_v26  ;;  %v356_v57 = vld [vmem:[%s1170_s3 + $0xa0] sm:$0xff]  ;;  %v247_v58 = vld [vmem:[%s235_s11 + $0x8] sm:$0xff]  ;;  %v338_v59 = vld [vmem:[%s1170_s3 + $0x10] sm:$0xff] }
  0x24   : > { %379 = vmatpush.msra.mxu2 %v344_v39  ;;  %401 = vmatpush.msra.mxu3 %v361_v40  ;;  %v355_v60 = vld [vmem:[%s1170_s3 + $0x98] sm:$0xff]  ;;  %v337_v61 = vld [vmem:[%s1170_s3 + $0x8] sm:$0xff]  ;;  %v354_v62 = vld [vmem:[%s1170_s3 + $0x90] sm:$0xff] }
  0x25   : > { %296 = vmatpush.msra.mxu0 %v258_v29  ;;  %319 = vmatpush.msra.mxu1 %v259_v30  ;;  %v336_v63 = vld [vmem:[%s1170_s3] sm:$0xff]  ;;  %v353_v0 = vld [vmem:[%s1170_s3 + $0x88] sm:$0xff] }
  0x26   : > { %380 = vmatpush.msra.mxu2 %v343_v43  ;;  %402 = vmatpush.msra.mxu3 %v360_v44  ;;  %v352_v1 = vld [vmem:[%s1170_s3 + $0x80] sm:$0xff] }
  0x27   : > { %297 = vmatpush.msra.mxu0 %v256_v33  ;;  %320 = vmatpush.msra.mxu1 %v257_v34  ;;  %v280_v2 = vld [vmem:[%s1169_s2] sm:$0x3] }
  0x28   : > { %381 = vmatpush.msra.mxu2 %v342_v47  ;;  %403 = vmatpush.msra.mxu3 %v359_v48  ;;  %v282_v3 = vperm.slane %v280_v2, 0  ;;  %v283_v4 = vperm.slane %v280_v2, 1  ;;  %v758_v17 = vld [vmem:[%s1171_s4] ss:$0 sm:$0xff] }
  0x29   : > { %298 = vmatpush.msra.mxu0 %v254_v37  ;;  %321 = vmatpush.msra.mxu1 %v255_v38 }
  0x2a   : > { %382 = vmatpush.msra.mxu2 %v341_v52  ;;  %404 = vmatpush.msra.mxu3 %v358_v53 }
  0x2b   : > { %299 = vmatpush.msra.mxu0 %v252_v41  ;;  %322 = vmatpush.msra.mxu1 %v253_v42 }
  0x2c   : > { %383 = vmatpush.msra.mxu2 %v340_v54  ;;  %405 = vmatpush.msra.mxu3 %v357_v55 }
  0x2d   : > { %300 = vmatpush.msra.mxu0 %v250_v45  ;;  %323 = vmatpush.msra.mxu1 %v251_v46 }
  0x2e   : > { %384 = vmatpush.msra.mxu2 %v339_v56  ;;  %406 = vmatpush.msra.mxu3 %v356_v57 }
  0x2f   : > { %301 = vmatpush.msra.mxu0 %v248_v49  ;;  %324 = vmatpush.msra.mxu1 %v249_v50 }
  0x30   : > { %302 = vmatmul.f32.vlgmr.msra.gmra.mxu0 %v246_v51  ;;  %325 = vmatmul.f32.vlgmr.msra.gmra.mxu1 %v246_v51 }
  0x31   : > { %385 = vmatpush.msra.mxu2 %v338_v59  ;;  %407 = vmatpush.msra.mxu3 %v355_v60 }
  0x33   : > { %386 = vmatpush.msra.mxu2 %v337_v61  ;;  %408 = vmatpush.msra.mxu3 %v354_v62 }
  0x35   : > { %387 = vmatpush.msra.mxu2 %v336_v63  ;;  %409 = vmatpush.msra.mxu3 %v353_v0 }
  0x37   : > { %410 = vmatpush.msra.mxu3 %v352_v1 }
  0x38   : > { %305 = vmatmul.f32.gmra.mxu0 %v247_v58  ;;  %328 = vmatmul.f32.gmra.mxu1 %v247_v58 }
  0xad   : > { %v303_v5 = vpop.f32.mrf.mxu0  ;;  %v326_v6 = vpop.f32.mrf.mxu1 }
  0xae   : > { %v304_v7 = vadd.f32 %v303_v5, %v282_v3  ;;  %v327_v8 = vadd.f32 %v326_v6, %v283_v4 }
  0xb0   : > { %v332_v9 = vmax.f32 %v304_v7, 0.0  ;;  %v333_v10 = vmax.f32 %v327_v8, 0.0 }
  0xb2   : > { %388 = vmatmul.f32.vlgmr.msra.gmra.mxu2 %v332_v9  ;;  %411 = vmatmul.f32.vlgmr.msra.gmra.mxu3 %v333_v10 }
  0xb5   : > { %v306_v11 = vpop.f32.mrf.mxu0  ;;  %v329_v12 = vpop.f32.mrf.mxu1 }
  0xb6   : > { %v307_v13 = vadd.f32 %v306_v11, %v282_v3  ;;  %v330_v14 = vadd.f32 %v329_v12, %v283_v4 }
  0xb8   : > { %v334_v15 = vmax.f32 %v307_v13, 0.0  ;;  %v335_v16 = vmax.f32 %v330_v14, 0.0 }
  0xba   : > { %391 = vmatmul.f32.gmra.mxu2 %v334_v15  ;;  %414 = vmatmul.f32.gmra.mxu3 %v335_v16 }
 0x135   : > { %v389_v18 = vpop.f32.mrf.mxu2  ;;  %v412_v19 = vpop.f32.mrf.mxu3 }
 0x136   : > { %v390_v20 = vadd.f32 %v758_v17, %v389_v18 }
 0x138   : > { %v413_v21 = vadd.f32 %v412_v19, %v390_v20 }
 0x13a   : > { %759 = vtanh.f32 %v413_v21 }
 0x13d   : > { %v392_v22 = vpop.f32.mrf.mxu2  ;;  %v415_v23 = vpop.f32.mrf.mxu3 }
 0x13e   : > { %v393_v24 = vadd.f32 %v758_v17, %v392_v22 }
 0x140   : > { %v760_v25 = vpop.eup %759  ;;  %v416_v26 = vadd.f32 %v415_v23, %v393_v24 }
 0x141   : > { %421 = vst.msk [vmem:[%s1122_s17] sm:$0xff] %vm420_vm0, %v760_v25 }
 0x142   : > { %761 = vtanh.f32 %v416_v26 }
 0x145   : > { %429 = sbr.rel (!%p906_p4) target bundleno = 369 (0x171), region = 44 }
 0x148   : > { %v762_v27 = vpop.eup %761 }
 0x149   : > { %422 = vst.msk [vmem:[%s1122_s17 + $0x8] sm:$0xff] %vm420_vm0, %v762_v27 }
 0x14a   : > { %s1178_s18 = smov (!%p432_p8, %s431_s18), 2 }
 0x14b   : > { %s652_s11 = sshll.u32 %s1178_s18, 3 }
 0x14c   : > { %p655_p9 = scmp.eq.s32.totalorder %s652_s11, 0 }
 0x14d   : > { %s1139_s27 = sshrl.u32 (!%p655_p9), %s1178_s18, 1 }
 0x14e   : > { %440 = sbr.rel (%p655_p9) target bundleno = 369 (0x171), region = 48  ;;  %p656_p10 = scmp.le.s32.totalorder (!%p655_p9), %s1139_s27, 0 }
 0x153   : > { %599 = sbr.rel (%p656_p10) target bundleno = 352 (0x160), region = 124  ;;  %s819_s21 = smov (!%p656_p10), %s1133_s24  }
 0x154   : > { %s823_s26 = smov (!%p656_p10), %s1122_s17   ;;  %s827_s23 = smov (!%p656_p10), 0  }
 0x155   : > { %s831_s28 = smov (!%p656_p10), 0  }
 0x158 LB: >> { %v505_v28 = vld [vmem:[%s825_s26] sm:$0xff]  ;;  %v507_v29 = vld [vmem:[%s825_s26 + $0x8] sm:$0xff]  ;;  %s509_s29 = sadd.s32 1, %s829_s23  ;;  %s499_s28 = sadd.s32 1, %s833_s28   ;;  %s833_s28 = sphi %s831_s28, %s499_s28   ;;  %s829_s23 = sphi %s827_s23, %s828_s23   ;;  %s825_s26 = sphi %s823_s26, %s514_s26   ;;  %s821_s21 = sphi %s819_s21, %s515_s21  }
 0x159   : >> { %506 = vst [vmem:[%s821_s21] sm:$0xff] %v505_v28  ;;  %p510_p11 = scmp.ge.s32.totalorder %s509_s29, %s1139_s27  ;;  %p498_p12 = scmp.ge.s32.totalorder %s499_s28, %s1139_s27 }
 0x15a   : >> { %508 = vst [vmem:[%s821_s21 + $0x8] sm:$0xff] %v507_v29 }
 0x15b   : >> { %s1180_s29 = smov (%p510_p11, %s509_s29), 0  ;;  %501 = sbr.rel (!%p498_p12) target bundleno = 344 (0x158), region = 130 }
 0x15c   : >> { %s657_s30 = sshll.u32 %s1180_s29, 4  ;;  %s828_s23 = smov %s1180_s29  }
 0x15d   : >> { %s514_s26 = scalar_lea.vmem %s1122_s17, %s657_s30 [#allocation2]   ;;  %s515_s21 = scalar_lea.vmem %s1133_s24, %s657_s30  }
 0x160 PF: > { %s1149_s6 = sand.u32 1, %s1178_s18   ;;  %s668_s7 = sshll.u32 %s1139_s27, 4 }
 0x161   : > { %s520_s10 = scalar_lea.vmem %s1122_s17, %s668_s7 [#allocation2]   ;;  %s522_s12 = scalar_lea.vmem %s1133_s24, %s668_s7  }
 0x162   : > { %p662_p13 = scmp.le.s32.totalorder %s1149_s6, 0 }
 0x163   : > { %s835_s13 = smov (!%p662_p13), %s522_s12   ;;  %s839_s14 = smov (!%p662_p13), %s520_s10  }
 0x164   : > { %613 = sbr.rel (%p662_p13) target bundleno = 369 (0x171), region = 135  ;;  %s843_s15 = smov (!%p662_p13), 0  }
 0x165   : > { %s847_s16 = smov (!%p662_p13), 0  }
 0x169 LB: >> { %v532_v30 = vld [vmem:[%s841_s14] sm:$0xff]  ;;  %s534_s18 = sadd.s32 1, %s845_s15  ;;  %s526_s16 = sadd.s32 1, %s849_s16   ;;  %s849_s16 = sphi %s847_s16, %s526_s16   ;;  %s845_s15 = sphi %s843_s15, %s844_s15   ;;  %s841_s14 = sphi %s839_s14, %s539_s14   ;;  %s837_s13 = sphi %s835_s13, %s540_s13  }
 0x16a   : >> { %533 = vst [vmem:[%s837_s13] sm:$0xff] %v532_v30  ;;  %p535_p0 = scmp.ge.s32.totalorder %s534_s18, %s1149_s6  ;;  %p525_p1 = scmp.ge.s32.totalorder %s526_s16, %s1149_s6 }
 0x16c   : >> { %s1182_s18 = smov (%p535_p0, %s534_s18), 0  ;;  %528 = sbr.rel (!%p525_p1) target bundleno = 361 (0x169), region = 141 }
 0x16d   : >> { %s663_s17 = sshll.u32 %s1182_s18, 3  ;;  %s844_s15 = smov %s1182_s18  }
 0x16e   : >> { %s539_s14 = scalar_lea.vmem %s520_s10, %s663_s17 [#allocation2]   ;;  %s540_s13 = scalar_lea.vmem %s522_s12, %s663_s17  }
 0x171 PF: > { %p12_p2 = scmp.ge.s32.totalorder %s896_s22, 6   ;;  %s1174_s18 = smov %s813_s19 }
 0x172   : > { %s1175_s19 = smov %s904_s25  ;;  %s1176_s20 = smov %s896_s22 }
 0x173   :  { %14 = sbr.rel (!%p12_p2) target bundleno = 2 (0x2), region = 152 }

</bundles_post_ra>
